<compile_context>
chip_gen: v5e
topology: v5e:2x2
jax: 0.10.0
libtpu: 0.0.40
codegen_flags: <defaults>
</compile_context>

<pallas_src>
import functools

import jax
import jax.numpy as jnp
import numpy as np
from jax import lax
from jax.experimental import pallas as pl
from jax.experimental.pallas import tpu as pltpu


def _round_up(x, m):
    return ((x + m - 1) // m) * m


def residual_block_kernel(x_ref, w1_ref, b1_ref, w2_ref, b2_ref,
                          w3_ref, b3_ref, o_ref, *, true_len):
    bn, l_pad, cin_p = x_ref.shape
    rows = bn * l_pad

    x = x_ref[...].reshape(rows, cin_p)                   # f32 (residual path)
    x_bf = x.astype(jnp.bfloat16)

    # conv1 (1x1) + ReLU  -> (rows, cout_p) f32
    h1 = jnp.dot(x_bf, w1_ref[...], preferred_element_type=jnp.float32)
    h1 = jnp.maximum(h1 + b1_ref[...], 0.0)

    # conv2 (k=3, pad=1): shifted copies via XLU roll; zero the rows that
    # correspond to the conv's zero padding (per-element boundary rows), which
    # also removes any cross-batch-element or L-padding leakage from the roll.
    pos = lax.broadcasted_iota(jnp.int32, h1.shape, 0) % l_pad   # row within element
    h_prev = jnp.where(pos == 0, 0.0,
                       pltpu.roll(h1, shift=1, axis=0))          # h1[l-1]
    h_next = jnp.where(pos == (true_len - 1), 0.0,
                       pltpu.roll(h1, shift=rows - 1, axis=0))   # h1[l+1]
    h_cat = jnp.concatenate([h_prev, h1, h_next], axis=1).astype(jnp.bfloat16)
    h2 = jnp.dot(h_cat, w2_ref[...], preferred_element_type=jnp.float32)
    h2 = jnp.maximum(h2 + b2_ref[...], 0.0).astype(jnp.bfloat16)

    # conv3 (1x1) + residual + ReLU
    h3 = jnp.dot(h2, w3_ref[...], preferred_element_type=jnp.float32)
    out = jnp.maximum(h3 + b3_ref[...] + x, 0.0)
    o_ref[...] = out.reshape(bn, l_pad, cin_p)


@jax.jit
def residual_block(x_ncl, w1_pt, b1, w2_pt, b2, w3_pt, b3):
    """x_ncl: (N, Cin, L) float32, PyTorch Conv1d layout. Returns (N, Cin, L) f32."""
    N, Cin, L = x_ncl.shape
    Cout = w1_pt.shape[0]
    Cin_p = _round_up(Cin, 128)
    Cout_p = _round_up(Cout, 128)
    L_pad = _round_up(L, 8)

    # channels-last, lane/sublane-padded input (residual stays f32 for accuracy)
    # TODO(synk): for very large tensors the NCL<->NLC transposes could be
    # folded into the kernel (in-kernel XLU transpose) to save an HBM round trip.
    x_nlc = jnp.transpose(x_ncl, (0, 2, 1)).astype(jnp.float32)
    x_nlc = jnp.pad(x_nlc, ((0, 0), (0, L_pad - L), (0, Cin_p - Cin)))

    # batch tiling: amortize per-grid-step overhead (~0.35 us/step), but keep
    # >= 2 parallel grid steps when N >= 2 (v7x has 2 TensorCores).
    rows_target = 512
    bn = max(1, min(N, rows_target // max(L_pad, 1)))
    if N >= 2:
        bn = min(bn, max(1, N // 2))
    num_blocks = -(-N // bn)
    n_pad = num_blocks * bn
    if n_pad != N:
        x_nlc = jnp.pad(x_nlc, ((0, n_pad - N), (0, 0), (0, 0)))

    # PyTorch (Cout, Cin, K) conv weights -> matmul orientation, zero-padded,
    # bf16 (f32 accumulation happens inside the kernel).
    w1 = jnp.transpose(w1_pt[:, :, 0], (1, 0))                       # (Cin, Cout)
    w1 = jnp.pad(w1, ((0, Cin_p - Cin), (0, Cout_p - Cout))).astype(jnp.bfloat16)

    w2t = jnp.transpose(w2_pt, (2, 1, 0))                            # (3, Cout, Cout): [k][i, o]
    w2t = jnp.pad(w2t, ((0, 0), (0, Cout_p - Cout), (0, Cout_p - Cout)))
    w2cat = w2t.reshape(3 * Cout_p, Cout_p).astype(jnp.bfloat16)     # fused taps, K = 3*Cout_p

    w3 = jnp.transpose(w3_pt[:, :, 0], (1, 0))                       # (Cout, Cin)
    w3 = jnp.pad(w3, ((0, Cout_p - Cout), (0, Cin_p - Cin))).astype(jnp.bfloat16)

    b1r = jnp.pad(b1, (0, Cout_p - Cout)).reshape(1, Cout_p).astype(jnp.float32)
    b2r = jnp.pad(b2, (0, Cout_p - Cout)).reshape(1, Cout_p).astype(jnp.float32)
    b3r = jnp.pad(b3, (0, Cin_p - Cin)).reshape(1, Cin_p).astype(jnp.float32)

    kernel = functools.partial(residual_block_kernel, true_len=L)

    out_nlc = pl.pallas_call(
        kernel,
        out_shape=jax.ShapeDtypeStruct((n_pad, L_pad, Cin_p), jnp.float32),
        grid_spec=pltpu.PrefetchScalarGridSpec(
            num_scalar_prefetch=0,
            grid=(num_blocks,),
            in_specs=[
                pl.BlockSpec((bn, L_pad, Cin_p), lambda b: (b, 0, 0)),    # x
                pl.BlockSpec((Cin_p, Cout_p), lambda b: (0, 0)),          # w1
                pl.BlockSpec((1, Cout_p), lambda b: (0, 0)),              # b1
                pl.BlockSpec((3 * Cout_p, Cout_p), lambda b: (0, 0)),     # w2 (fused 3 taps)
                pl.BlockSpec((1, Cout_p), lambda b: (0, 0)),              # b2
                pl.BlockSpec((Cout_p, Cin_p), lambda b: (0, 0)),          # w3
                pl.BlockSpec((1, Cin_p), lambda b: (0, 0)),               # b3
            ],
            out_specs=pl.BlockSpec((bn, L_pad, Cin_p), lambda b: (b, 0, 0)),
        ),
        compiler_params=pltpu.CompilerParams(
            dimension_semantics=("parallel",)),
    )(x_nlc, w1, b1r, w2cat, b2r, w3, b3r)

    return jnp.transpose(out_nlc[:N, :L, :Cin], (0, 2, 1))


def reference_residual_block(x, w1_pt, b1, w2_pt, b2, w3_pt, b3):
    """Independent pure-JAX (f32) reference in PyTorch NCL layout."""
    dn = ('NCH', 'OIH', 'NCH')

    def conv1d(x, w, b, pad):
        y = jax.lax.conv_general_dilated(x, w, window_strides=(1,),
                                         padding=[(pad, pad)],
                                         dimension_numbers=dn)
        return y + b[None, :, None]

    h = jax.nn.relu(conv1d(x, w1_pt, b1, 0))
    h = jax.nn.relu(conv1d(h, w2_pt, b2, 1))
    h = conv1d(h, w3_pt, b3, 0)
    return jax.nn.relu(h + x)


if __name__ == "__main__":
    # Small shapes consistent with the module: N=2, in_channels=4, out_channels=8, L=16
    N, Cin, Cout, L = 2, 4, 8, 16
    key = jax.random.PRNGKey(0)
    kx, k1, k2, k3, kb1, kb2, kb3 = jax.random.split(key, 7)

    x = jax.random.normal(kx, (N, Cin, L), dtype=jnp.float32)

    # Deterministic synthetic parameters (PyTorch Conv1d weight layout: (Cout, Cin, K))
    w1_pt = 0.1 * jax.random.normal(k1, (Cout, Cin, 1), dtype=jnp.float32)
    b1 = 0.1 * jax.random.normal(kb1, (Cout,), dtype=jnp.float32)
    w2_pt = 0.1 * jax.random.normal(k2, (Cout, Cout, 3), dtype=jnp.float32)
    b2 = 0.1 * jax.random.normal(kb2, (Cout,), dtype=jnp.float32)
    w3_pt = 0.1 * jax.random.normal(k3, (Cin, Cout, 1), dtype=jnp.float32)
    b3 = 0.1 * jax.random.normal(kb3, (Cin,), dtype=jnp.float32)

    out = residual_block(x, w1_pt, b1, w2_pt, b2, w3_pt, b3)
    out = jax.block_until_ready(out)

    ref = reference_residual_block(x, w1_pt, b1, w2_pt, b2, w3_pt, b3)
    # bf16 matmul inputs (f32 accumulation) -> loosened tolerance vs f32 reference.
    np.testing.assert_allclose(np.asarray(out), np.asarray(ref), rtol=2e-2, atol=2e-2)

    print("KERNEL_OK")
</pallas_src>

<mosaic_0001>
module attributes {stable_mosaic.version = 11 : i64} {
  func.func @residual_block_kernel(%arg0: i32, %arg1: memref<1x16x128xf32, #tpu.memory_space<vmem>>, %arg2: memref<128x128xbf16, #tpu.memory_space<vmem>>, %arg3: memref<1x128xf32, #tpu.memory_space<vmem>>, %arg4: memref<384x128xbf16, #tpu.memory_space<vmem>>, %arg5: memref<1x128xf32, #tpu.memory_space<vmem>>, %arg6: memref<128x128xbf16, #tpu.memory_space<vmem>>, %arg7: memref<1x128xf32, #tpu.memory_space<vmem>>, %arg8: memref<1x16x128xf32, #tpu.memory_space<vmem>>) attributes {dimension_semantics = [#tpu.dimension_semantics<parallel>], iteration_bounds = array<i64: 2>, scalar_prefetch = 0 : i64, scratch_operands = 0 : i64, tpu.core_type = #tpu.core_type<tc>, window_params = [{transform_indices = @transform_0, window_bounds = array<i64: 1, 16, 128>}, {pipeline_mode = #tpu.pipeline_mode<synchronous>, transform_indices = @transform_1, window_bounds = array<i64: 128, 128>}, {pipeline_mode = #tpu.pipeline_mode<synchronous>, transform_indices = @transform_2, window_bounds = array<i64: 1, 128>}, {pipeline_mode = #tpu.pipeline_mode<synchronous>, transform_indices = @transform_3, window_bounds = array<i64: 384, 128>}, {pipeline_mode = #tpu.pipeline_mode<synchronous>, transform_indices = @transform_4, window_bounds = array<i64: 1, 128>}, {pipeline_mode = #tpu.pipeline_mode<synchronous>, transform_indices = @transform_5, window_bounds = array<i64: 128, 128>}, {pipeline_mode = #tpu.pipeline_mode<synchronous>, transform_indices = @transform_6, window_bounds = array<i64: 1, 128>}, {transform_indices = @transform_7, window_bounds = array<i64: 1, 16, 128>}]} {
    %c0 = arith.constant 0 : index
    %c0_0 = arith.constant 0 : index
    %c0_1 = arith.constant 0 : index
    %0 = vector.load %arg1[%c0, %c0_0, %c0_1] : memref<1x16x128xf32, #tpu.memory_space<vmem>>, vector<1x16x128xf32>
    %1 = vector.shape_cast %0 : vector<1x16x128xf32> to vector<16x128xf32>
    %2 = arith.truncf %1 : vector<16x128xf32> to vector<16x128xbf16>
    %c0_2 = arith.constant 0 : index
    %c0_3 = arith.constant 0 : index
    %3 = vector.load %arg2[%c0_2, %c0_3] : memref<128x128xbf16, #tpu.memory_space<vmem>>, vector<128x128xbf16>
    %cst = arith.constant dense<0.000000e+00> : vector<16x128xf32>
    %4 = tpu.matmul %2, %3, %cst {dimension_numbers = #tpu.dot_dimension_numbers<[1], [0], [0], [1], [0, 0, 1, 1], [], []>} : vector<16x128xbf16>, vector<128x128xbf16>, vector<16x128xf32> -> vector<16x128xf32>
    %c0_4 = arith.constant 0 : index
    %c0_5 = arith.constant 0 : index
    %5 = vector.load %arg3[%c0_4, %c0_5] : memref<1x128xf32, #tpu.memory_space<vmem>>, vector<1x128xf32>
    %6 = vector.broadcast %5 : vector<1x128xf32> to vector<16x128xf32>
    %7 = arith.addf %4, %6 : vector<16x128xf32>
    %cst_6 = arith.constant 0.000000e+00 : f32
    %8 = vector.broadcast %cst_6 : f32 to vector<16x128xf32>
    %9 = arith.maximumf %7, %8 : vector<16x128xf32>
    %10 = tpu.iota {dimensions = array<i32: 0>} : vector<16x128xi32>
    %c16_i32 = arith.constant 16 : i32
    %c0_i32 = arith.constant 0 : i32
    %11 = arith.cmpi eq, %c16_i32, %c0_i32 : i32
    %c1_i32 = arith.constant 1 : i32
    %12 = arith.select %11, %c1_i32, %c16_i32 : i32
    %13 = vector.broadcast %12 : i32 to vector<16x128xi32>
    %14 = arith.remsi %10, %13 : vector<16x128xi32>
    %c0_i32_7 = arith.constant 0 : i32
    %15 = vector.broadcast %c0_i32_7 : i32 to vector<16x128xi32>
    %16 = arith.cmpi ne, %14, %15 : vector<16x128xi32>
    %c0_i32_8 = arith.constant 0 : i32
    %17 = vector.broadcast %c0_i32_8 : i32 to vector<16x128xi32>
    %18 = arith.cmpi slt, %14, %17 : vector<16x128xi32>
    %c0_i32_9 = arith.constant 0 : i32
    %19 = arith.cmpi slt, %12, %c0_i32_9 : i32
    %20 = vector.broadcast %19 : i1 to vector<16x128xi1>
    %21 = vector.broadcast %20 : vector<16x128xi1> to vector<16x128xi1>
    %22 = arith.xori %18, %21 : vector<16x128xi1>
    %23 = arith.andi %22, %16 : vector<16x128xi1>
    %24 = vector.broadcast %12 : i32 to vector<16x128xi32>
    %25 = arith.addi %14, %24 : vector<16x128xi32>
    %26 = arith.select %23, %25, %14 : vector<16x128xi1>, vector<16x128xi32>
    %c0_i32_10 = arith.constant 0 : i32
    %27 = vector.broadcast %c0_i32_10 : i32 to vector<16x128xi32>
    %28 = arith.cmpi eq, %26, %27 : vector<16x128xi32>
    %c1_i32_11 = arith.constant 1 : i32
    %29 = tpu.dynamic_rotate %9 by %c1_i32_11 dim 0 : vector<16x128xf32>, i32 -> vector<16x128xf32>
    %cst_12 = arith.constant 0.000000e+00 : f32
    %30 = vector.broadcast %cst_12 : f32 to vector<16x128xf32>
    %31 = arith.select %28, %30, %29 : vector<16x128xi1>, vector<16x128xf32>
    %c15_i32 = arith.constant 15 : i32
    %32 = vector.broadcast %c15_i32 : i32 to vector<16x128xi32>
    %33 = arith.cmpi eq, %26, %32 : vector<16x128xi32>
    %c15_i32_13 = arith.constant 15 : i32
    %34 = tpu.dynamic_rotate %9 by %c15_i32_13 dim 0 : vector<16x128xf32>, i32 -> vector<16x128xf32>
    %cst_14 = arith.constant 0.000000e+00 : f32
    %35 = vector.broadcast %cst_14 : f32 to vector<16x128xf32>
    %36 = arith.select %33, %35, %34 : vector<16x128xi1>, vector<16x128xf32>
    %37 = tpu.concatenate %31, %9, %36 in 1 : vector<16x128xf32>, vector<16x128xf32>, vector<16x128xf32> -> vector<16x384xf32>
    %38 = arith.truncf %37 : vector<16x384xf32> to vector<16x384xbf16>
    %c0_15 = arith.constant 0 : index
    %c0_16 = arith.constant 0 : index
    %39 = vector.load %arg4[%c0_15, %c0_16] : memref<384x128xbf16, #tpu.memory_space<vmem>>, vector<384x128xbf16>
    %cst_17 = arith.constant dense<0.000000e+00> : vector<16x128xf32>
    %40 = tpu.matmul %38, %39, %cst_17 {dimension_numbers = #tpu.dot_dimension_numbers<[1], [0], [0], [1], [0, 0, 1, 1], [], []>} : vector<16x384xbf16>, vector<384x128xbf16>, vector<16x128xf32> -> vector<16x128xf32>
    %c0_18 = arith.constant 0 : index
    %c0_19 = arith.constant 0 : index
    %41 = vector.load %arg5[%c0_18, %c0_19] : memref<1x128xf32, #tpu.memory_space<vmem>>, vector<1x128xf32>
    %42 = vector.broadcast %41 : vector<1x128xf32> to vector<16x128xf32>
    %43 = arith.addf %40, %42 : vector<16x128xf32>
    %cst_20 = arith.constant 0.000000e+00 : f32
    %44 = vector.broadcast %cst_20 : f32 to vector<16x128xf32>
    %45 = arith.maximumf %43, %44 : vector<16x128xf32>
    %46 = arith.truncf %45 : vector<16x128xf32> to vector<16x128xbf16>
    %c0_21 = arith.constant 0 : index
    %c0_22 = arith.constant 0 : index
    %47 = vector.load %arg6[%c0_21, %c0_22] : memref<128x128xbf16, #tpu.memory_space<vmem>>, vector<128x128xbf16>
    %cst_23 = arith.constant dense<0.000000e+00> : vector<16x128xf32>
    %48 = tpu.matmul %46, %47, %cst_23 {dimension_numbers = #tpu.dot_dimension_numbers<[1], [0], [0], [1], [0, 0, 1, 1], [], []>} : vector<16x128xbf16>, vector<128x128xbf16>, vector<16x128xf32> -> vector<16x128xf32>
    %c0_24 = arith.constant 0 : index
    %c0_25 = arith.constant 0 : index
    %49 = vector.load %arg7[%c0_24, %c0_25] : memref<1x128xf32, #tpu.memory_space<vmem>>, vector<1x128xf32>
    %50 = vector.broadcast %49 : vector<1x128xf32> to vector<16x128xf32>
    %51 = arith.addf %48, %50 : vector<16x128xf32>
    %52 = arith.addf %51, %1 : vector<16x128xf32>
    %cst_26 = arith.constant 0.000000e+00 : f32
    %53 = vector.broadcast %cst_26 : f32 to vector<16x128xf32>
    %54 = arith.maximumf %52, %53 : vector<16x128xf32>
    %55 = vector.shape_cast %54 : vector<16x128xf32> to vector<1x16x128xf32>
    %c0_27 = arith.constant 0 : index
    %c0_28 = arith.constant 0 : index
    %c0_29 = arith.constant 0 : index
    %56 = vector.load %arg8[%c0_27, %c0_28, %c0_29] : memref<1x16x128xf32, #tpu.memory_space<vmem>>, vector<1x16x128xf32>
    tpu.vector_store %arg8[%c0_27, %c0_28, %c0_29], %55 {strides = array<i32>} : memref<1x16x128xf32, #tpu.memory_space<vmem>>, vector<1x16x128xf32>,
    return
  }
  func.func @transform_0(%arg0: i32) -> (i32, i32, i32) {
    %c0_i32 = arith.constant 0 : i32
    %c0_i32_0 = arith.constant 0 : i32
    %c0_i32_1 = arith.constant 0 : i32
    return %arg0, %c0_i32, %c0_i32_0 : i32, i32, i32
  }
  func.func @transform_1(%arg0: i32) -> (i32, i32) {
    %c0_i32 = arith.constant 0 : i32
    %c0_i32_0 = arith.constant 0 : i32
    %c0_i32_1 = arith.constant 0 : i32
    return %c0_i32, %c0_i32_0 : i32, i32
  }
  func.func @transform_2(%arg0: i32) -> (i32, i32) {
    %c0_i32 = arith.constant 0 : i32
    %c0_i32_0 = arith.constant 0 : i32
    %c0_i32_1 = arith.constant 0 : i32
    return %c0_i32, %c0_i32_0 : i32, i32
  }
  func.func @transform_3(%arg0: i32) -> (i32, i32) {
    %c0_i32 = arith.constant 0 : i32
    %c0_i32_0 = arith.constant 0 : i32
    %c0_i32_1 = arith.constant 0 : i32
    return %c0_i32, %c0_i32_0 : i32, i32
  }
  func.func @transform_4(%arg0: i32) -> (i32, i32) {
    %c0_i32 = arith.constant 0 : i32
    %c0_i32_0 = arith.constant 0 : i32
    %c0_i32_1 = arith.constant 0 : i32
    return %c0_i32, %c0_i32_0 : i32, i32
  }
  func.func @transform_5(%arg0: i32) -> (i32, i32) {
    %c0_i32 = arith.constant 0 : i32
    %c0_i32_0 = arith.constant 0 : i32
    %c0_i32_1 = arith.constant 0 : i32
    return %c0_i32, %c0_i32_0 : i32, i32
  }
  func.func @transform_6(%arg0: i32) -> (i32, i32) {
    %c0_i32 = arith.constant 0 : i32
    %c0_i32_0 = arith.constant 0 : i32
    %c0_i32_1 = arith.constant 0 : i32
    return %c0_i32, %c0_i32_0 : i32, i32
  }
  func.func @transform_7(%arg0: i32) -> (i32, i32, i32) {
    %c0_i32 = arith.constant 0 : i32
    %c0_i32_0 = arith.constant 0 : i32
    %c0_i32_1 = arith.constant 0 : i32
    return %arg0, %c0_i32, %c0_i32_0 : i32, i32, i32
  }
}

</mosaic_0001>

<bundles_post_ra>
// kernel: residual_block.1
= control target key start
LH: loop header
LB: loop body
LE: loop exit
PB: predicated region body
PF: predicated region fallthrough
CT: control target
= control target key end

     0   :  { %s1082_s24 = smov 0   ;;  %s1247_s0 = inlined_call_operand.vmem [shape: f32[2,16,128], index: 0, kind: input, shape index: {}]   ;;  %s1248_s1 = inlined_call_operand.vmem [shape: bf16[128,128], index: 1, kind: input, shape index: {}]   ;;  %s1249_s2 = inlined_call_operand.vmem [shape: f32[1,128], index: 2, kind: input, shape index: {}]   ;;  %s1250_s3 = inlined_call_operand.vmem [shape: bf16[384,128], index: 3, kind: input, shape index: {}]   ;;  %s1251_s4 = inlined_call_operand.vmem [shape: f32[1,128], index: 4, kind: input, shape index: {}]   ;;  %s1252_s5 = inlined_call_operand.vmem [shape: bf16[128,128], index: 5, kind: input, shape index: {}]   ;;  %s1253_s6 = inlined_call_operand.vmem [shape: f32[1,128], index: 6, kind: input, shape index: {}]   ;;  %s1254_s7 = inlined_call_operand.vmem [shape: f32[2,16,128], index: 7, kind: output, shape index: {}]  }
   0x1 LB: > { %s798_s25 = sadd.s32 4294967295, %s1039_s24   ;;  %p802_p0 = scmp.ge.s32.totalorder %s1039_s24, 1  ;;  %s1039_s24 = sphi %s1082_s24, %s17_s24  }
   0x2   : > { %p237_p1 = scmp.lt.s32.totalorder %s1039_s24, 3 }
   0x4   : > { %p238_p2 = pnand %p802_p0, %p237_p1 }
   0x5   : > { %p269_p3 = scmp.lt.s32.totalorder (!%p238_p2), %s798_s25, 1 }
   0x6   : > { %241 = sbr.rel (%p238_p2) target bundleno = 473 (0x1d9), region = 48 }
   0xb   : > { %v986_v0 = vld [vmem:[%s1248_s1 + $0x38] sm:$0xff]  ;;  %v985_v1 = vld [vmem:[%s1248_s1 + $0x30] sm:$0xff]  ;;  %v984_v8 = vld [vmem:[%s1248_s1 + $0x28] sm:$0xff]  ;;  %s1256_s25 = smov (!%p269_p3, %s798_s25), 1  ;;  %v366_v38 = vlaneseq  ;;  %vm1041_vm4 = vmmov 1  }
   0xc   : > { %350 = vmatpush.bf16.msra.mxu0 %v986_v0  ;;  %v1002_v2 = vld [vmem:[%s1250_s3 + $0x78] sm:$0xff]  ;;  %v1001_v5 = vld [vmem:[%s1250_s3 + $0x70] sm:$0xff]  ;;  %v1000_v9 = vld [vmem:[%s1250_s3 + $0x68] sm:$0xff]  ;;  %s977_s18 = sshll.u32 %s1256_s25, 4 }
   0xd   : > { %v994_v3 = vld [vmem:[%s1250_s3 + $0x38] sm:$0xff]  ;;  %624 = vmatpush.bf16.msra.mxu2 %v1002_v2  ;;  %v993_v6 = vld [vmem:[%s1250_s3 + $0x30] sm:$0xff]  ;;  %v992_v10 = vld [vmem:[%s1250_s3 + $0x28] sm:$0xff]  ;;  %s273_s23 = scalar_lea.vmem %s1247_s0, %s977_s18  ;;  %v367_v41 = vshrl.u32 %v366_v38, 7  ;;  %s278_s13 = scalar_lea.vmem %s1254_s7, %s977_s18 }
   0xe   : > { %v1010_v4 = vld [vmem:[%s1250_s3 + $0xb8] sm:$0xff]  ;;  %610 = vmatpush.bf16.msra.mxu1 %v994_v3  ;;  %v1009_v7 = vld [vmem:[%s1250_s3 + $0xb0] sm:$0xff]  ;;  %v1008_v11 = vld [vmem:[%s1250_s3 + $0xa8] sm:$0xff] }
   0xf   : > { %638 = vmatpush.bf16.msra.mxu3 %v1010_v4  ;;  %v983_v12 = vld [vmem:[%s1248_s1 + $0x20] sm:$0xff]  ;;  %v982_v16 = vld [vmem:[%s1248_s1 + $0x18] sm:$0xff]  ;;  %v981_v17 = vld [vmem:[%s1248_s1 + $0x10] sm:$0xff]  ;;  %v368_v43 = vadd.s32 8, %v367_v41  ;;  %v373_v44 = vand.u32 15, %v367_v41  ;;  %vm397_vm1 = vcmp.lt.s32.totalorder %v367_v41, 1 }
  0x10   : > { %351 = vmatpush.bf16.msra.mxu0 %v985_v1  ;;  %v999_v13 = vld [vmem:[%s1250_s3 + $0x60] sm:$0xff]  ;;  %v980_v18 = vld [vmem:[%s1248_s1 + $0x8] sm:$0xff]  ;;  %v998_v23 = vld [vmem:[%s1250_s3 + $0x58] sm:$0xff]  ;;  %vm406_vm2 = vcmp.lt.s32.totalorder %v367_v41, 7 }
  0x11   : > { %625 = vmatpush.bf16.msra.mxu2 %v1001_v5  ;;  %v991_v14 = vld [vmem:[%s1250_s3 + $0x20] sm:$0xff]  ;;  %v1164_v21 = vld [vmem:[%s273_s23 + $0x8] sm:$0xff]  ;;  %v990_v24 = vld [vmem:[%s1250_s3 + $0x18] sm:$0xff]  ;;  %v380_v47 = vand.u32 15, %v368_v43  ;;  %vm1019_vm0 = vcmp.ne.s32.totalorder %v373_v44, 0 }
  0x12   : > { %611 = vmatpush.bf16.msra.mxu1 %v993_v6  ;;  %v1007_v15 = vld [vmem:[%s1250_s3 + $0xa0] sm:$0xff]  ;;  %v1006_v25 = vld [vmem:[%s1250_s3 + $0x98] sm:$0xff]  ;;  %v997_v26 = vld [vmem:[%s1250_s3 + $0x50] sm:$0xff] }
  0x13   : > { %639 = vmatpush.bf16.msra.mxu3 %v1009_v7  ;;  %v979_v19 = vld [vmem:[%s1248_s1] sm:$0xff]  ;;  %v989_v27 = vld [vmem:[%s1250_s3 + $0x10] sm:$0xff]  ;;  %v996_v29 = vld [vmem:[%s1250_s3 + $0x48] sm:$0xff]  ;;  %vm1020_vm3 = vcmp.ne.s32.totalorder %v380_v47, 15 }
  0x14   : > { %352 = vmatpush.bf16.msra.mxu0 %v984_v8  ;;  %v1162_v20 = vld [vmem:[%s273_s23] sm:$0xff]  ;;  %v1005_v28 = vld [vmem:[%s1250_s3 + $0x90] sm:$0xff]  ;;  %v988_v30 = vld [vmem:[%s1250_s3 + $0x8] sm:$0xff] }
  0x15   : > { %626 = vmatpush.bf16.msra.mxu2 %v1000_v9  ;;  %v281_v22 = vpack.c.bf16 %v1164_v21, %v1162_v20  ;;  %v1004_v31 = vld [vmem:[%s1250_s3 + $0x88] sm:$0xff]  ;;  %v995_v32 = vld [vmem:[%s1250_s3 + $0x40] sm:$0xff]  ;;  %v1018_v35 = vld [vmem:[%s1252_s5 + $0x38] sm:$0xff] }
  0x16   : > { %612 = vmatpush.bf16.msra.mxu1 %v992_v10  ;;  %v987_v33 = vld [vmem:[%s1250_s3] sm:$0xff]  ;;  %v1017_v36 = vld [vmem:[%s1252_s5 + $0x30] sm:$0xff]  ;;  %v1016_v37 = vld [vmem:[%s1252_s5 + $0x28] sm:$0xff] }
  0x17   : > { %640 = vmatpush.bf16.msra.mxu3 %v1008_v11  ;;  %v1003_v34 = vld [vmem:[%s1250_s3 + $0x80] sm:$0xff]  ;;  %vm936_vm5 = vmpackc.low %vm1041_vm4, %vm1019_vm0  ;;  %v1014_v62 = vld [vmem:[%s1252_s5 + $0x18] sm:$0xff] }
  0x18   : > { %353 = vmatpush.bf16.msra.mxu0 %v983_v12  ;;  %v1030_v39 = vld [vmem:[%s1249_s2] ss:$0 sm:$0xff]  ;;  %vm940_vm6 = vmpackc.low %vm1020_vm3, %vm1041_vm4  ;;  %v1013_v63 = vld [vmem:[%s1252_s5 + $0x10] sm:$0xff] }
  0x19   : > { %627 = vmatpush.bf16.msra.mxu2 %v999_v13  ;;  %v1015_v61 = vld [vmem:[%s1252_s5 + $0x20] sm:$0xff]  ;;  %v1012_v0 = vld [vmem:[%s1252_s5 + $0x8] sm:$0xff] }
  0x1a   : > { %613 = vmatpush.bf16.msra.mxu1 %v991_v14  ;;  %v1011_v1 = vld [vmem:[%s1252_s5] sm:$0xff] }
  0x1b   : > { %641 = vmatpush.bf16.msra.mxu3 %v1007_v15  ;;  %v1031_v3 = vld [vmem:[%s1251_s4] ss:$0 sm:$0xff] }
  0x1c   : > { %354 = vmatpush.bf16.msra.mxu0 %v982_v16 }
  0x1d   : > { %628 = vmatpush.bf16.msra.mxu2 %v998_v23 }
  0x1e   : > { %614 = vmatpush.bf16.msra.mxu1 %v990_v24 }
  0x1f   : > { %642 = vmatpush.bf16.msra.mxu3 %v1006_v25 }
  0x20   : > { %355 = vmatpush.bf16.msra.mxu0 %v981_v17 }
  0x21   : > { %629 = vmatpush.bf16.msra.mxu2 %v997_v26 }
  0x22   : > { %615 = vmatpush.bf16.msra.mxu1 %v989_v27 }
  0x23   : > { %643 = vmatpush.bf16.msra.mxu3 %v1005_v28 }
  0x24   : > { %356 = vmatpush.bf16.msra.mxu0 %v980_v18  ;;  %v1032_v18 = vld [vmem:[%s1253_s6] ss:$0 sm:$0xff] }
  0x25   : > { %630 = vmatpush.bf16.msra.mxu2 %v996_v29 }
  0x26   : > { %616 = vmatpush.bf16.msra.mxu1 %v988_v30 }
  0x27   : > { %644 = vmatpush.bf16.msra.mxu3 %v1004_v31 }
  0x28   : > { %357 = vmatpush.bf16.msra.mxu0 %v979_v19 }
  0x29   : > { %631 = vmatpush.bf16.msra.mxu2 %v995_v32 }
  0x2a   : > { %617 = vmatpush.bf16.msra.mxu1 %v987_v33 }
  0x2b   : > { %358 = vmatmul.bf16.vlgmr.msra.gmra.mxu0 %v281_v22  ;;  %645 = vmatpush.bf16.msra.mxu3 %v1003_v34 }
  0x2c   : > { %723 = vmatpush.bf16.msrb.mxu0 %v1018_v35 }
  0x30   : > { %724 = vmatpush.bf16.msrb.mxu0 %v1017_v36 }
  0x34   : > { %725 = vmatpush.bf16.msrb.mxu0 %v1016_v37 }
  0x38   : > { %726 = vmatpush.bf16.msrb.mxu0 %v1015_v61 }
  0x3c   : > { %727 = vmatpush.bf16.msrb.mxu0 %v1014_v62 }
  0x40   : > { %728 = vmatpush.bf16.msrb.mxu0 %v1013_v63 }
  0x44   : > { %729 = vmatpush.bf16.msrb.mxu0 %v1012_v0 }
  0x48   : > { %730 = vmatpush.bf16.msrb.mxu0 %v1011_v1 }
  0xa8   : > { %v359_v40 = vpop.f32.mrf.mxu0 }
  0xa9   : > { %v360_v42 = vadd.f32 %v1030_v39, %v359_v40 }
  0xab   : > { %v364_v45 = vmax.f32 %v360_v42, 0.0 }
  0xad   : > { %v395_v50 = vrot.slane %v364_v45, 7  ;;  %v404_v51 = vrot.slane %v364_v45, 1 }
  0xb0   : > { %v361_v46 = vpop.f32.mrf.mxu0 }
  0xb1   : > { %v362_v48 = vadd.f32 %v1030_v39, %v361_v46 }
  0xb3   : > { %v365_v49 = vmax.f32 %v362_v48, 0.0 }
  0xb5   : > { %v396_v52 = vrot.slane %v365_v49, 7  ;;  %v405_v53 = vrot.slane %v365_v49, 1  ;;  %v412_v54 = vpack.c.bf16 %v365_v49, %v364_v45 }
  0xb7   : > { %632 = vmatmul.bf16.vlgmr.msra.gmra.mxu2 %v412_v54  ;;  %v398_v55 = vsel %vm397_vm1, %v395_v50, %v396_v52  ;;  %v399_v56 = vsel %vm397_vm1, %v396_v52, %v395_v50  ;;  %v407_v57 = vsel %vm406_vm2, %v404_v51, %v405_v53  ;;  %v408_v58 = vsel %vm406_vm2, %v405_v53, %v404_v51 }
  0xb8   : > { %v937_v59 = vpack.c.bf16 %v398_v55, %v399_v56  ;;  %v941_v60 = vpack.c.bf16 %v408_v58, %v407_v57 }
  0xba   : > { %938 = vmatmul.msk.bf16.vlgmr.msra.gmra.mxu1 %vm936_vm5, %v937_v59  ;;  %942 = vmatmul.msk.bf16.vlgmr.msra.gmra.mxu3 %vm940_vm6, %v941_v60 }
 0x137   : > { %v619_v2 = vpop.f32.mrf.mxu1 }
 0x138   : > { %v620_v5 = vadd.f32 %v1031_v3, %v619_v2 }
 0x13a   : > { %v633_v4 = vpop.f32.mrf.mxu2 }
 0x13b   : > { %v634_v8 = vadd.f32 %v633_v4, %v620_v5 }
 0x13d   : > { %v647_v6 = vpop.f32.mrf.mxu3 }
 0x13e   : > { %v648_v12 = vadd.f32 %v647_v6, %v634_v8 }
 0x13f   : > { %v621_v7 = vpop.f32.mrf.mxu1 }
 0x140   : > { %v622_v9 = vadd.f32 %v1031_v3, %v621_v7  ;;  %v652_v15 = vmax.f32 %v648_v12, 0.0 }
 0x142   : > { %v635_v10 = vpop.f32.mrf.mxu2 }
 0x143   : > { %v636_v11 = vadd.f32 %v635_v10, %v622_v9 }
 0x145   : > { %v649_v13 = vpop.f32.mrf.mxu3 }
 0x146   : > { %v650_v14 = vadd.f32 %v649_v13, %v636_v11 }
 0x148   : > { %v653_v16 = vmax.f32 %v650_v14, 0.0 }
 0x14a   : > { %v654_v17 = vpack.c.bf16 %v653_v16, %v652_v15 }
 0x14c   : > { %731 = vmatmul.bf16.vlgmr.msrb.gmra.mxu0 %v654_v17 }
 0x1c9   : > { %v732_v19 = vpop.f32.mrf.mxu0 }
 0x1ca   : > { %v733_v22 = vadd.f32 %v1032_v18, %v732_v19 }
 0x1cc   : > { %v737_v23 = vadd.f32 %v733_v22, %v1162_v20 }
 0x1ce   : > { %v739_v24 = vmax.f32 %v737_v23, 0.0 }
 0x1d0   : > { %741 = vst [vmem:[%s278_s13] sm:$0xff] %v739_v24 }
 0x1d1   : > { %v734_v25 = vpop.f32.mrf.mxu0 }
 0x1d2   : > { %v735_v26 = vadd.f32 %v1032_v18, %v734_v25 }
 0x1d4   : > { %v738_v27 = vadd.f32 %v735_v26, %v1164_v21 }
 0x1d6   : > { %v740_v28 = vmax.f32 %v738_v27, 0.0 }
 0x1d8   : > { %742 = vst [vmem:[%s278_s13 + $0x8] sm:$0xff] %v740_v28 }
 0x1d9 PF: > { %s17_s24 = sadd.s32 1, %s1039_s24  }
 0x1da   : > { %p14_p4 = scmp.ge.s32.totalorder %s17_s24, 4  }
 0x1dc   :  { %16 = sbr.rel (!%p14_p4) target bundleno = 1 (0x1), region = 78 }

</bundles_post_ra>
